<compile_context>
chip_gen: v7x
topology: tpu7x:2x2x1
jax: 0.10.0
libtpu: 0.0.40
codegen_flags: <defaults>
</compile_context>

<pallas_src>
import functools

import jax
import jax.numpy as jnp
from jax.experimental import pallas as pl
from jax.experimental.pallas import tpu as pltpu


def _round_up(n, m):
    return ((n + m - 1) // m) * m


def _mlp_kernel(degree, x_ref, w1_ref, w2_ref, b2_ref, out_ref):
    """Fused poly-features + fc1 + ReLU + fc2 on a sublane+lane dense batch tile.

    The batch tile holds 8*TL samples laid out as (8 sublanes, TL lanes).
    Per-sublane block-diagonal weights let both linear layers run as plain
    2-D MXU matmuls while the batch stays dense in (8,128) vreg tiles.

      x_ref  : (8, TL)                      input samples (f32)
      w1_ref : (8*hidden, 8*(degree+1))     block-diag [b1 | W1] (bias folded)
      w2_ref : (8, 8*hidden)                block-diag fc2 weight row
      b2_ref : (1, 1) in SMEM               fc2 bias scalar
      out_ref: (8, TL)
    """
    x = x_ref[...]                                     # (8, TL)

    # Feature matrix F[k*8 + s, l] = x[s, l]**k for k = 0..degree (VPU only).
    feats = [jnp.ones_like(x), x]
    p = x
    for _ in range(degree - 1):
        p = p * x
        feats.append(p)
    f = jnp.concatenate(feats, axis=0)                 # (8*(degree+1), TL)

    # fc1 + bias as one MXU matmul: (8H, 8K) @ (8K, TL) -> (8H, TL)
    pre = jnp.dot(w1_ref[...], f, preferred_element_type=jnp.float32)
    h = jnp.maximum(pre, 0.0)                          # ReLU (VPU)

    # fc2 as an MXU matmul: (8, 8H) @ (8H, TL) -> (8, TL)
    out = jnp.dot(w2_ref[...], h, preferred_element_type=jnp.float32)
    out_ref[...] = (out + b2_ref[0, 0]).astype(out_ref.dtype)


def neural_network_forward(x, nn_params, *, degree, tile_b=32768):
    """Pallas equivalent of NeuralNetworkForStandardTraining.forward.

    x         : (N,) float32 — one scalar sample per row
    nn_params : flat parameter vector in PyTorch order [W1, b1, W2, b2]
                (same packing as transform_parameters_to_tensor()).
    Returns (N, 1) float32.
    """
    hidden = 10 * degree
    n_w1 = hidden * degree
    k = degree + 1                                     # poly degree + bias column

    # --- plain-JAX parameter repacking (done once, outside the kernel) -----
    nn_params = nn_params.astype(jnp.float32)
    w1 = nn_params[:n_w1].reshape(hidden, degree)
    b1 = nn_params[n_w1:n_w1 + hidden]
    w2 = nn_params[n_w1 + hidden:n_w1 + 2 * hidden]            # (hidden,)
    b2 = nn_params[n_w1 + 2 * hidden:n_w1 + 2 * hidden + 1].reshape(1, 1)

    # Fold b1 into fc1 (constant-one feature) and build per-sublane
    # block-diagonal weights so both layers are 2-D MXU matmuls.
    w1_aug = jnp.concatenate([b1.reshape(hidden, 1), w1], axis=1)   # (hidden, k)
    eye8 = jnp.eye(8, dtype=jnp.float32)
    w1_big = jnp.einsum('jk,st->jskt', w1_aug, eye8).reshape(8 * hidden, 8 * k)
    w2_big = jnp.einsum('j,st->sjt', w2, eye8).reshape(8, 8 * hidden)

    # --- batch tiling: (8 sublanes, TL lanes) dense tiles -------------------
    N = x.shape[0]
    BLOCK = 1024                              # 8 sublanes * 128 lanes (minimum)
    n_req = _round_up(max(N, 1), BLOCK)
    tile = max(BLOCK, (min(tile_b, n_req) // BLOCK) * BLOCK)
    # v7x megacore: keep >= 2 grid steps when the batch allows it.
    if n_req > BLOCK and n_req // tile < 2:
        tile = max(BLOCK, (tile // 2 // BLOCK) * BLOCK)
    n_pad = _round_up(n_req, tile)
    tl = tile // 8                            # lanes per block
    cols = n_pad // 8

    # Dense sublane+lane packing (zero padded; padded samples sliced off later).
    x_flat = jnp.zeros((n_pad,), jnp.float32).at[:N].set(
        x.reshape(-1).astype(jnp.float32))
    x_packed = x_flat.reshape(8, cols)

    grid = (n_pad // tile,)

    # Advisory cost estimate (block-diagonal matmuls + feature build).
    flops = 16 * int(n_pad) * hidden * (k + 1)
    cost = pl.CostEstimate(flops=flops, transcendentals=0,
                           bytes_accessed=8 * int(n_pad) + 4 * int(nn_params.size))

    out_packed = pl.pallas_call(
        functools.partial(_mlp_kernel, degree),
        out_shape=jax.ShapeDtypeStruct((8, cols), jnp.float32),
        grid=grid,
        in_specs=[
            pl.BlockSpec((8, tl), lambda i: (0, i)),               # x, dense tile
            pl.BlockSpec((8 * hidden, 8 * k), lambda i: (0, 0)),   # fc1 block-diag
            pl.BlockSpec((8, 8 * hidden), lambda i: (0, 0)),       # fc2 block-diag
            pl.BlockSpec(memory_space=pltpu.MemorySpace.SMEM),     # b2 scalar
        ],
        out_specs=pl.BlockSpec((8, tl), lambda i: (0, i)),         # dense out tile
        compiler_params=pltpu.CompilerParams(
            dimension_semantics=("parallel",)),
        cost_estimate=cost,
    )(x_packed, w1_big, w2_big, b2)

    return out_packed.reshape(-1)[:N].reshape(N, 1)


def _reference_forward(x, nn_params, degree):
    """Pure-JAX reference mirroring the PyTorch module (for validation)."""
    hidden = 10 * degree
    n_w1 = hidden * degree
    nn_params = nn_params.astype(jnp.float32)
    w1 = nn_params[:n_w1].reshape(hidden, degree)
    b1 = nn_params[n_w1:n_w1 + hidden]
    w2 = nn_params[n_w1 + hidden:n_w1 + 2 * hidden].reshape(1, hidden)
    b2 = nn_params[n_w1 + 2 * hidden:n_w1 + 2 * hidden + 1]
    xcol = x.reshape(-1, 1).astype(jnp.float32)
    feats = jnp.concatenate([xcol ** i for i in range(1, degree + 1)], axis=1)
    h = jnp.maximum(feats @ w1.T + b1, 0.0)
    return h @ w2.T + b2


if __name__ == "__main__":
    # Module config: degree-4 polynomial features, MLP 4 -> 40 -> 1
    degree = 4
    hidden = 10 * degree
    total_params = hidden * degree + hidden + hidden + 1   # 241

    key = jax.random.PRNGKey(0)
    kx, kp = jax.random.split(key)
    N = 16
    x = jax.random.normal(kx, (N,), dtype=jnp.float32)
    nn_params = 0.1 * jax.random.normal(kp, (total_params,), dtype=jnp.float32)

    out = jax.block_until_ready(neural_network_forward(x, nn_params, degree=degree))
    ref = _reference_forward(x, nn_params, degree)
    assert out.shape == (N, 1), out.shape
    assert jnp.allclose(out, ref, atol=1e-4, rtol=1e-4), (out, ref)

    # Tail handling: batch size not a multiple of the 1024-sample tile.
    N2 = 200
    x2 = jax.random.normal(jax.random.PRNGKey(1), (N2,), dtype=jnp.float32)
    out2 = jax.block_until_ready(
        neural_network_forward(x2, nn_params, degree=degree))
    ref2 = _reference_forward(x2, nn_params, degree)
    assert out2.shape == (N2, 1), out2.shape
    assert jnp.allclose(out2, ref2, atol=1e-4, rtol=1e-4)

    # Multi-step grid (exercises the >=2-step split + block index maps).
    N3 = 2500
    x3 = jax.random.normal(jax.random.PRNGKey(2), (N3,), dtype=jnp.float32)
    out3 = jax.block_until_ready(
        neural_network_forward(x3, nn_params, degree=degree))
    ref3 = _reference_forward(x3, nn_params, degree)
    assert out3.shape == (N3, 1), out3.shape
    assert jnp.allclose(out3, ref3, atol=1e-4, rtol=1e-4)

    print("KERNEL_OK")
</pallas_src>

<mosaic_0001>
module attributes {stable_mosaic.version = 11 : i64} {
  func.func @_mlp_kernel(%arg0: i32, %arg1: memref<8x128xf32, #tpu.memory_space<vmem>>, %arg2: memref<320x40xf32, #tpu.memory_space<vmem>>, %arg3: memref<8x320xf32, #tpu.memory_space<vmem>>, %arg4: memref<1x1xf32, #tpu.memory_space<smem>>, %arg5: memref<8x128xf32, #tpu.memory_space<vmem>>) attributes {dimension_semantics = [#tpu.dimension_semantics<parallel>], iteration_bounds = array<i64: 1>, scalar_prefetch = 0 : i64, scratch_operands = 0 : i64, tpu.core_type = #tpu.core_type<tc>, window_params = [{transform_indices = @transform_0, window_bounds = array<i64: 8, 128>}, {pipeline_mode = #tpu.pipeline_mode<synchronous>, transform_indices = @transform_1, window_bounds = array<i64: 320, 40>}, {pipeline_mode = #tpu.pipeline_mode<synchronous>, transform_indices = @transform_2, window_bounds = array<i64: 8, 320>}, {transform_indices = @transform_3, window_bounds = array<i64: 1, 1>}, {transform_indices = @transform_4, window_bounds = array<i64: 8, 128>}]} {
    %c0 = arith.constant 0 : index
    %c0_0 = arith.constant 0 : index
    %0 = vector.load %arg1[%c0, %c0_0] : memref<8x128xf32, #tpu.memory_space<vmem>>, vector<8x128xf32>
    %cst = arith.constant 1.000000e+00 : f32
    %1 = vector.broadcast %cst : f32 to vector<8x128xf32>
    %2 = arith.mulf %0, %0 : vector<8x128xf32>
    %3 = arith.mulf %2, %0 : vector<8x128xf32>
    %4 = arith.mulf %3, %0 : vector<8x128xf32>
    %5 = tpu.concatenate %1, %0, %2, %3, %4 in 0 : vector<8x128xf32>, vector<8x128xf32>, vector<8x128xf32>, vector<8x128xf32>, vector<8x128xf32> -> vector<40x128xf32>
    %c0_1 = arith.constant 0 : index
    %c0_2 = arith.constant 0 : index
    %6 = vector.load %arg2[%c0_1, %c0_2] : memref<320x40xf32, #tpu.memory_space<vmem>>, vector<320x40xf32>
    %cst_3 = arith.constant dense<0.000000e+00> : vector<320x128xf32>
    %7 = tpu.matmul %6, %5, %cst_3 {dimension_numbers = #tpu.dot_dimension_numbers<[1], [0], [0], [1], [0, 0, 1, 1], [], []>} : vector<320x40xf32>, vector<40x128xf32>, vector<320x128xf32> -> vector<320x128xf32>
    %cst_4 = arith.constant 0.000000e+00 : f32
    %8 = vector.broadcast %cst_4 : f32 to vector<320x128xf32>
    %9 = arith.maximumf %7, %8 : vector<320x128xf32>
    %c0_5 = arith.constant 0 : index
    %c0_6 = arith.constant 0 : index
    %10 = vector.load %arg3[%c0_5, %c0_6] : memref<8x320xf32, #tpu.memory_space<vmem>>, vector<8x320xf32>
    %cst_7 = arith.constant dense<0.000000e+00> : vector<8x128xf32>
    %11 = tpu.matmul %10, %9, %cst_7 {dimension_numbers = #tpu.dot_dimension_numbers<[1], [0], [0], [1], [0, 0, 1, 1], [], []>} : vector<8x320xf32>, vector<320x128xf32>, vector<8x128xf32> -> vector<8x128xf32>
    %c0_8 = arith.constant 0 : index
    %c0_9 = arith.constant 0 : index
    %12 = memref.load %arg4[%c0_8, %c0_9] : memref<1x1xf32, #tpu.memory_space<smem>>
    %13 = vector.broadcast %12 : f32 to vector<8x128xf32>
    %14 = arith.addf %11, %13 : vector<8x128xf32>
    %c0_10 = arith.constant 0 : index
    %c0_11 = arith.constant 0 : index
    %15 = vector.load %arg5[%c0_10, %c0_11] : memref<8x128xf32, #tpu.memory_space<vmem>>, vector<8x128xf32>
    tpu.vector_store %arg5[%c0_10, %c0_11], %14 {strides = array<i32>} : memref<8x128xf32, #tpu.memory_space<vmem>>, vector<8x128xf32>,
    return
  }
  func.func @transform_0(%arg0: i32) -> (i32, i32) {
    %c0_i32 = arith.constant 0 : i32
    %c0_i32_0 = arith.constant 0 : i32
    return %c0_i32, %arg0 : i32, i32
  }
  func.func @transform_1(%arg0: i32) -> (i32, i32) {
    %c0_i32 = arith.constant 0 : i32
    %c0_i32_0 = arith.constant 0 : i32
    %c0_i32_1 = arith.constant 0 : i32
    return %c0_i32, %c0_i32_0 : i32, i32
  }
  func.func @transform_2(%arg0: i32) -> (i32, i32) {
    %c0_i32 = arith.constant 0 : i32
    %c0_i32_0 = arith.constant 0 : i32
    %c0_i32_1 = arith.constant 0 : i32
    return %c0_i32, %c0_i32_0 : i32, i32
  }
  func.func @transform_3(%arg0: i32) -> (i32, i32) {
    %c0_i32 = arith.constant 0 : i32
    %c0_i32_0 = arith.constant 0 : i32
    %c0_i32_1 = arith.constant 0 : i32
    return %c0_i32, %c0_i32_0 : i32, i32
  }
  func.func @transform_4(%arg0: i32) -> (i32, i32) {
    %c0_i32 = arith.constant 0 : i32
    %c0_i32_0 = arith.constant 0 : i32
    return %c0_i32, %arg0 : i32, i32
  }
}

</mosaic_0001>

<bundles_post_ra>
// kernel: tpu_custom_call.1
= control target key start
LH: loop header
LB: loop body
LE: loop exit
PB: predicated region body
PF: predicated region fallthrough
CT: control target
= control target key end

     0   :  { %vm63_vm0 = vcmask 326656   ;;  %v953_v2 = vmov 1.0   ;;  %s1170_s0 = inlined_call_operand.vmem [shape: f32[8,128], index: 0, kind: input, shape index: {}]   ;;  %s1171_s1 = inlined_call_operand.vmem [shape: f32[320,40], index: 1, kind: input, shape index: {}]   ;;  %s1172_s2 = inlined_call_operand.vmem [shape: f32[8,320], index: 2, kind: input, shape index: {}]   ;;  %s1173_s3 = inlined_call_operand.<no memory space> [shape: f32[1,1], index: 3, kind: input, shape index: {}]   ;;  %s1174_s4 = inlined_call_operand.hbm [shape: f32[8,128], index: 4, kind: output, shape index: {}]  }
   0x1   :  { %v19_v0 = vld [vmem:[%s1170_s0] sm:$0xff]  ;;  %v24_v8 = vld [vmem:[%s1171_s1 + $0x8] sm:$0xff]  ;;  %v25_v9 = vld [vmem:[%s1171_s1 + $0x10] sm:$0xff] }
   0x2   :  { %v23_v1 = vld [vmem:[%s1171_s1] sm:$0xff]  ;;  %v872_v3 = vpack.c.bf16 %v19_v0, %v953_v2  ;;  %v20_v4 = vmul.f32 %v19_v0, %v19_v0 }
   0x3   :  { %793 = vmatprep.mubr.msk.f32.mxu0 %vm63_vm0, %v23_v1 }
   0x4   :  { %873 = vmatprep.subr.bf16.mxu0 %v872_v3  ;;  %v21_v5 = vmul.f32 %v20_v4, %v19_v0 }
   0x5   :  { %875 = vmatpush3.bf16.msra.mxu0 %v872_v3 }
   0x6   :  { %v876_v6 = vpack.c.bf16 %v21_v5, %v20_v4  ;;  %v22_v7 = vmul.f32 %v21_v5, %v19_v0 }
   0x8   :  { %877 = vmatprep.subr.bf16.mxu0 %v876_v6 }
   0x9   :  { %879 = vmatpush3.bf16.msra.mxu0 %v876_v6 }
   0xa   :  { %791 = vmatprep.subr.mxu0 %v22_v7 }
   0xd   :  { %792 = vmatpush3.msra.mxu0 %v22_v7 }
   0xe   :  { %794 = vmatmul.mubr.msk.f32.vlgmr.msra.gmra.mrb[0].mxu0 %vm63_vm0, %v24_v8 }
   0xf   :  { %10 = vsyncpa [#allocation4], 0  ;;  %796 = vmatprep.mubr.msk.f32.mxu0 %vm63_vm0, %v25_v9  ;;  %v26_v10 = vld [vmem:[%s1171_s1 + $0x18] sm:$0xff]  ;;  %v27_v11 = vld [vmem:[%s1171_s1 + $0x20] sm:$0xff]  ;;  %vm955_vm1 = vmmov 0   ;;  %vm494_vm2 = vcmask 523264  }
  0x10   :  { %v28_v12 = vld [vmem:[%s1171_s1 + $0x28] sm:$0xff]  ;;  %v29_v13 = vld [vmem:[%s1171_s1 + $0x30] sm:$0xff]  ;;  %v30_v14 = vld [vmem:[%s1171_s1 + $0x38] sm:$0xff]  ;;  %s957_s22 = smov [#allocation3]  }
  0x11   :  { %v31_v15 = vld [vmem:[%s1171_s1 + $0x40] sm:$0xff]  ;;  %v32_v16 = vld [vmem:[%s1171_s1 + $0x48] sm:$0xff]  ;;  %v33_v17 = vld [vmem:[%s1171_s1 + $0x50] sm:$0xff]  ;;  %s645_s23 = sshll.u32 %s957_s22, 4  ;;  %s646_s23 = int_to_ptr.vmem [resolvable:$true] %s645_s23 }
  0x12   :  { %797 = vmatmul.mubr.msk.f32.gmra.mrb[2].mxu0 %vm63_vm0, %v26_v10  ;;  %v34_v18 = vld [vmem:[%s1171_s1 + $0x58] sm:$0xff]  ;;  %v35_v19 = vld [vmem:[%s1171_s1 + $0x60] sm:$0xff]  ;;  %v36_v20 = vld [vmem:[%s1171_s1 + $0x68] sm:$0xff]  ;;  %s929_s24 = scalar_lea.vmem %s646_s23, 128  ;;  %p934_p1 = scmp.lt.s32.totalorder %s646_s23, %s646_s23 }
  0x13   :  { %799 = vmatprep.mubr.msk.f32.mxu0 %vm63_vm0, %v27_v11  ;;  %v37_v21 = vld [vmem:[%s1171_s1 + $0x70] sm:$0xff]  ;;  %v38_v22 = vld [vmem:[%s1171_s1 + $0x78] sm:$0xff]  ;;  %v39_v23 = vld [vmem:[%s1171_s1 + $0x80] sm:$0xff]  ;;  %p930_p0 = scmp.ne.s32.totalorder %s646_s23, %s929_s24  ;;  %p935_p2 = scmp.lt.s32.totalorder %s929_s24, %s929_s24 }
  0x14   :  { %v40_v24 = vld [vmem:[%s1171_s1 + $0x88] sm:$0xff]  ;;  %v41_v25 = vld [vmem:[%s1171_s1 + $0x90] sm:$0xff]  ;;  %v42_v26 = vld [vmem:[%s1171_s1 + $0x98] sm:$0xff] }
  0x15   :  { %v43_v27 = vld [vmem:[%s1171_s1 + $0xa0] sm:$0xff]  ;;  %v44_v28 = vld [vmem:[%s1171_s1 + $0xa8] sm:$0xff]  ;;  %v45_v29 = vld [vmem:[%s1171_s1 + $0xb0] sm:$0xff]  ;;  %p936_p3 = por %p935_p2, %p934_p1 }
  0x16   :  { %800 = vmatmul.mubr.msk.f32.gmra.mrb[4].mxu0 %vm63_vm0, %v28_v12  ;;  %v46_v30 = vld [vmem:[%s1171_s1 + $0xb8] sm:$0xff]  ;;  %v47_v31 = vld [vmem:[%s1171_s1 + $0xc0] sm:$0xff]  ;;  %v48_v32 = vld [vmem:[%s1171_s1 + $0xc8] sm:$0xff] }
  0x17   :  { %802 = vmatprep.mubr.msk.f32.mxu0 %vm63_vm0, %v29_v13  ;;  %v49_v33 = vld [vmem:[%s1171_s1 + $0xd0] sm:$0xff]  ;;  %v50_v34 = vld [vmem:[%s1171_s1 + $0xd8] sm:$0xff]  ;;  %v51_v35 = vld [vmem:[%s1171_s1 + $0xe0] sm:$0xff]  ;;  %p937_p4 = pnand %p936_p3, %p930_p0 }
  0x18   :  { %v52_v36 = vld [vmem:[%s1171_s1 + $0xe8] sm:$0xff]  ;;  %v53_v37 = vld [vmem:[%s1171_s1 + $0xf0] sm:$0xff]  ;;  %v54_v38 = vld [vmem:[%s1171_s1 + $0xf8] sm:$0xff] }
  0x19   :  { %v55_v39 = vld [vmem:[%s1171_s1 + $0x100] sm:$0xff]  ;;  %v56_v40 = vld [vmem:[%s1171_s1 + $0x108] sm:$0xff]  ;;  %v57_v41 = vld [vmem:[%s1171_s1 + $0x110] sm:$0xff] }
  0x1a   :  { %803 = vmatmul.mubr.msk.f32.gmra.mrb[6].mxu0 %vm63_vm0, %v30_v14  ;;  %v58_v42 = vld [vmem:[%s1171_s1 + $0x118] sm:$0xff]  ;;  %v59_v43 = vld [vmem:[%s1171_s1 + $0x120] sm:$0xff]  ;;  %v60_v44 = vld [vmem:[%s1171_s1 + $0x128] sm:$0xff] }
  0x1b   :  { %805 = vmatprep.mubr.msk.f32.mxu0 %vm63_vm0, %v31_v15  ;;  %v61_v45 = vld [vmem:[%s1171_s1 + $0x130] sm:$0xff]  ;;  %v62_v46 = vld [vmem:[%s1171_s1 + $0x138] sm:$0xff]  ;;  %v490_v47 = vld [vmem:[%s1172_s2 + $0x8] sm:$0xff] }
  0x1c   :  { %562 = vmatprep.mubr.f32.mxu1 %v490_v47 }
  0x1e   :  { %806 = vmatmul.mubr.msk.f32.gmra.mrb[8].mxu0 %vm63_vm0, %v32_v16 }
  0x1f   :  { %808 = vmatprep.mubr.msk.f32.mxu0 %vm63_vm0, %v33_v17 }
  0x22   :  { %809 = vmatmul.mubr.msk.f32.gmra.mrb[10].mxu0 %vm63_vm0, %v34_v18 }
  0x23   :  { %811 = vmatprep.mubr.msk.f32.mxu0 %vm63_vm0, %v35_v19 }
  0x26   :  { %812 = vmatmul.mubr.msk.f32.gmra.mrb[12].mxu0 %vm63_vm0, %v36_v20 }
  0x27   :  { %814 = vmatprep.mubr.msk.f32.mxu0 %vm63_vm0, %v37_v21 }
  0x2a   :  { %815 = vmatmul.mubr.msk.f32.gmra.mrb[14].mxu0 %vm63_vm0, %v38_v22 }
  0x2b   :  { %817 = vmatprep.mubr.msk.f32.mxu0 %vm63_vm0, %v39_v23 }
  0x2e   :  { %818 = vmatmul.mubr.msk.f32.gmra.mrb[16].mxu0 %vm63_vm0, %v40_v24 }
  0x2f   :  { %820 = vmatprep.mubr.msk.f32.mxu0 %vm63_vm0, %v41_v25 }
  0x32   :  { %821 = vmatmul.mubr.msk.f32.gmra.mrb[18].mxu0 %vm63_vm0, %v42_v26 }
  0x33   :  { %823 = vmatprep.mubr.msk.f32.mxu0 %vm63_vm0, %v43_v27 }
  0x36   :  { %824 = vmatmul.mubr.msk.f32.gmra.mrb[20].mxu0 %vm63_vm0, %v44_v28 }
  0x37   :  { %826 = vmatprep.mubr.msk.f32.mxu0 %vm63_vm0, %v45_v29 }
  0x3a   :  { %827 = vmatmul.mubr.msk.f32.gmra.mrb[22].mxu0 %vm63_vm0, %v46_v30 }
  0x3b   :  { %829 = vmatprep.mubr.msk.f32.mxu0 %vm63_vm0, %v47_v31 }
  0x3e   :  { %830 = vmatmul.mubr.msk.f32.gmra.mrb[24].mxu0 %vm63_vm0, %v48_v32 }
  0x3f   :  { %832 = vmatprep.mubr.msk.f32.mxu0 %vm63_vm0, %v49_v33 }
  0x42   :  { %833 = vmatmul.mubr.msk.f32.gmra.mrb[26].mxu0 %vm63_vm0, %v50_v34 }
  0x43   :  { %835 = vmatprep.mubr.msk.f32.mxu0 %vm63_vm0, %v51_v35 }
  0x46   :  { %836 = vmatmul.mubr.msk.f32.gmra.mrb[28].mxu0 %vm63_vm0, %v52_v36 }
  0x47   :  { %838 = vmatprep.mubr.msk.f32.mxu0 %vm63_vm0, %v53_v37 }
  0x4a   :  { %839 = vmatmul.mubr.msk.f32.gmra.mrb[30].mxu0 %vm63_vm0, %v54_v38 }
  0x4b   :  { %841 = vmatprep.mubr.msk.f32.mxu0 %vm63_vm0, %v55_v39 }
  0x4e   :  { %842 = vmatmul.mubr.msk.f32.gmra.mrb[32].mxu0 %vm63_vm0, %v56_v40 }
  0x4f   :  { %844 = vmatprep.mubr.msk.f32.mxu0 %vm63_vm0, %v57_v41 }
  0x52   :  { %845 = vmatmul.mubr.msk.f32.gmra.mrb[34].mxu0 %vm63_vm0, %v58_v42 }
  0x53   :  { %847 = vmatprep.mubr.msk.f32.mxu0 %vm63_vm0, %v59_v43 }
  0x56   :  { %848 = vmatmul.mubr.msk.f32.gmra.mrb[36].mxu0 %vm63_vm0, %v60_v44 }
  0x57   :  { %850 = vmatprep.mubr.msk.f32.mxu0 %vm63_vm0, %v61_v45 }
  0x5a   :  { %851 = vmatmul.mubr.msk.f32.gmra.mrb[38].mxu0 %vm63_vm0, %v62_v46 }
  0xe1   :  { %v795_v48 = vpop.f32.mrb[0].mxu0 }
  0xe2   :  { %v450_v49 = vmax.f32 %v795_v48, 0.0  ;;  %v250_v50 = vpop.f32.mrb[1].mxu0 }
  0xe3   :  { %v449_v51 = vmax.f32 %v250_v50, 0.0 }
  0xe5   :  { %v798_v52 = vpop.f32.mrb[2].mxu0  ;;  %v882_v53 = vpack.c.bf16 %v450_v49, %v449_v51 }
  0xe6   :  { %v452_v54 = vmax.f32 %v798_v52, 0.0  ;;  %v260_v55 = vpop.f32.mrb[3].mxu0 }
  0xe7   :  { %v451_v56 = vmax.f32 %v260_v55, 0.0 }
  0xe9   :  { %v886_v57 = vpack.c.bf16 %v452_v54, %v451_v56  ;;  %v801_v58 = vpop.f32.mrb[4].mxu0 }
  0xea   :  { %v454_v59 = vmax.f32 %v801_v58, 0.0  ;;  %v270_v60 = vpop.f32.mrb[5].mxu0 }
  0xeb   :  { %v453_v61 = vmax.f32 %v270_v60, 0.0 }
  0xed   :  { %v890_v62 = vpack.c.bf16 %v454_v59, %v453_v61  ;;  %v804_v63 = vpop.f32.mrb[6].mxu0 }
  0xee   :  { %v456_v0 = vmax.f32 %v804_v63, 0.0  ;;  %v280_v1 = vpop.f32.mrb[7].mxu0 }
  0xef   :  { %v455_v2 = vmax.f32 %v280_v1, 0.0 }
  0xf1   :  { %v894_v3 = vpack.c.bf16 %v456_v0, %v455_v2  ;;  %v807_v4 = vpop.f32.mrb[8].mxu0 }
  0xf2   :  { %v458_v5 = vmax.f32 %v807_v4, 0.0  ;;  %v290_v6 = vpop.f32.mrb[9].mxu0  ;;  %v489_v4 = vld [vmem:[%s1172_s2] sm:$0xff] }
  0xf3   :  { %v457_v7 = vmax.f32 %v290_v6, 0.0 }
  0xf5   :  { %v898_v8 = vpack.c.bf16 %v458_v5, %v457_v7  ;;  %v810_v9 = vpop.f32.mrb[10].mxu0  ;;  %v954_v7 = vmov 0.0|0.0  }
  0xf6   :  { %v460_v10 = vmax.f32 %v810_v9, 0.0  ;;  %v300_v11 = vpop.f32.mrb[11].mxu0 }
  0xf7   :  { %v459_v12 = vmax.f32 %v300_v11, 0.0  ;;  %v956_v11 = vmov 0.0  }
  0xf9   :  { %v902_v13 = vpack.c.bf16 %v460_v10, %v459_v12  ;;  %v813_v14 = vpop.f32.mrb[12].mxu0 }
  0xfa   :  { %v462_v15 = vmax.f32 %v813_v14, 0.0  ;;  %v310_v16 = vpop.f32.mrb[13].mxu0 }
  0xfb   :  { %v461_v17 = vmax.f32 %v310_v16, 0.0 }
  0xfd   :  { %v906_v18 = vpack.c.bf16 %v462_v15, %v461_v17  ;;  %v816_v19 = vpop.f32.mrb[14].mxu0 }
  0xfe   :  { %v464_v20 = vmax.f32 %v816_v19, 0.0  ;;  %v320_v21 = vpop.f32.mrb[15].mxu0 }
  0xff   :  { %v463_v22 = vmax.f32 %v320_v21, 0.0 }
 0x101   :  { %v910_v23 = vpack.c.bf16 %v464_v20, %v463_v22  ;;  %v819_v24 = vpop.f32.mrb[16].mxu0 }
 0x102   :  { %v466_v25 = vmax.f32 %v819_v24, 0.0  ;;  %v330_v26 = vpop.f32.mrb[17].mxu0 }
 0x103   :  { %v465_v27 = vmax.f32 %v330_v26, 0.0 }
 0x105   :  { %v822_v28 = vpop.f32.mrb[18].mxu0  ;;  %v880_v29 = vpack.c.bf16 %v466_v25, %v465_v27  ;;  %v493_v27 = vstv %s1173_s3 }
 0x106   :  { %v468_v30 = vmax.f32 %v822_v28, 0.0  ;;  %v340_v31 = vpop.f32.mrb[19].mxu0 }
 0x107   :  { %v467_v32 = vmax.f32 %v340_v31, 0.0  ;;  %881 = vmatprep.subr.bf16.mxu1 %v880_v29 }
 0x108   :  { %883 = vmatpush3.bf16.msra.mxu1 %v882_v53 }
 0x109   :  { %v884_v33 = vpack.c.bf16 %v468_v30, %v467_v32  ;;  %v825_v34 = vpop.f32.mrb[20].mxu0 }
 0x10a   :  { %v470_v35 = vmax.f32 %v825_v34, 0.0  ;;  %v350_v36 = vpop.f32.mrb[21].mxu0 }
 0x10b   :  { %v469_v37 = vmax.f32 %v350_v36, 0.0  ;;  %885 = vmatprep.subr.bf16.mxu1 %v884_v33 }
 0x10c   :  { %887 = vmatpush3.bf16.msra.mxu1 %v886_v57 }
 0x10d   :  { %v888_v38 = vpack.c.bf16 %v470_v35, %v469_v37  ;;  %v828_v39 = vpop.f32.mrb[22].mxu0 }
 0x10e   :  { %v472_v40 = vmax.f32 %v828_v39, 0.0  ;;  %v360_v41 = vpop.f32.mrb[23].mxu0 }
 0x10f   :  { %v471_v42 = vmax.f32 %v360_v41, 0.0  ;;  %889 = vmatprep.subr.bf16.mxu1 %v888_v38 }
 0x110   :  { %891 = vmatpush3.bf16.msra.mxu1 %v890_v62 }
 0x111   :  { %v892_v43 = vpack.c.bf16 %v472_v40, %v471_v42  ;;  %v831_v44 = vpop.f32.mrb[24].mxu0 }
 0x112   :  { %v474_v45 = vmax.f32 %v831_v44, 0.0  ;;  %v370_v46 = vpop.f32.mrb[25].mxu0 }
 0x113   :  { %v473_v47 = vmax.f32 %v370_v46, 0.0  ;;  %893 = vmatprep.subr.bf16.mxu1 %v892_v43 }
 0x114   :  { %895 = vmatpush3.bf16.msra.mxu1 %v894_v3 }
 0x115   :  { %v896_v48 = vpack.c.bf16 %v474_v45, %v473_v47  ;;  %v834_v49 = vpop.f32.mrb[26].mxu0 }
 0x116   :  { %v476_v50 = vmax.f32 %v834_v49, 0.0  ;;  %v380_v51 = vpop.f32.mrb[27].mxu0 }
 0x117   :  { %v475_v52 = vmax.f32 %v380_v51, 0.0  ;;  %897 = vmatprep.subr.bf16.mxu1 %v896_v48 }
 0x118   :  { %899 = vmatpush3.bf16.msra.mxu1 %v898_v8 }
 0x119   :  { %v900_v53 = vpack.c.bf16 %v476_v50, %v475_v52  ;;  %v837_v54 = vpop.f32.mrb[28].mxu0 }
 0x11a   :  { %v478_v55 = vmax.f32 %v837_v54, 0.0  ;;  %v390_v56 = vpop.f32.mrb[29].mxu0 }
 0x11b   :  { %v477_v57 = vmax.f32 %v390_v56, 0.0  ;;  %901 = vmatprep.subr.bf16.mxu1 %v900_v53 }
 0x11c   :  { %903 = vmatpush3.bf16.msra.mxu1 %v902_v13 }
 0x11d   :  { %v904_v58 = vpack.c.bf16 %v478_v55, %v477_v57  ;;  %v840_v59 = vpop.f32.mrb[30].mxu0 }
 0x11e   :  { %v480_v60 = vmax.f32 %v840_v59, 0.0  ;;  %v400_v61 = vpop.f32.mrb[31].mxu0 }
 0x11f   :  { %v479_v62 = vmax.f32 %v400_v61, 0.0  ;;  %905 = vmatprep.subr.bf16.mxu1 %v904_v58 }
 0x120   :  { %907 = vmatpush3.bf16.msra.mxu1 %v906_v18 }
 0x121   :  { %v908_v63 = vpack.c.bf16 %v480_v60, %v479_v62  ;;  %v843_v0 = vpop.f32.mrb[32].mxu0 }
 0x122   :  { %v482_v1 = vmax.f32 %v843_v0, 0.0  ;;  %v410_v2 = vpop.f32.mrb[33].mxu0 }
 0x123   :  { %v481_v3 = vmax.f32 %v410_v2, 0.0  ;;  %909 = vmatprep.subr.bf16.mxu1 %v908_v63 }
 0x124   :  { %911 = vmatpush3.bf16.msra.mxu1 %v910_v23  ;;  %v491_v23 = vld [vmem:[%s1172_s2 + $0x10] sm:$0xff] }
 0x125   :  { %v913_v5 = vpack.c.bf16 %v482_v1, %v481_v3  ;;  %v846_v6 = vpop.f32.mrb[34].mxu0  ;;  %912 = vmatprep.subr.bf16.mxu1 %v954_v7 }
 0x126   :  { %v484_v8 = vmax.f32 %v846_v6, 0.0  ;;  %v420_v9 = vpop.f32.mrb[35].mxu0 }
 0x127   :  { %v483_v10 = vmax.f32 %v420_v9, 0.0  ;;  %563 = vmatmul.mubr.f32.vlgmr.msra.gmra.mrb[0].mxu1 %v489_v4 }
 0x128   :  { %914 = vmatpush3.bf16.msra.mxu1 %v913_v5  ;;  %869 = vmatprep.mubr.msk.f32.mxu1 %vm955_vm1, %v956_v11 }
 0x129   :  { %v916_v12 = vpack.c.bf16 %v484_v8, %v483_v10  ;;  %v849_v13 = vpop.f32.mrb[36].mxu0  ;;  %915 = vmatprep.subr.bf16.mxu1 %v954_v7 }
 0x12a   :  { %v486_v14 = vmax.f32 %v849_v13, 0.0  ;;  %v430_v15 = vpop.f32.mrb[37].mxu0 }
 0x12b   :  { %v485_v16 = vmax.f32 %v430_v15, 0.0 }
 0x12c   :  { %917 = vmatpush3.bf16.msra.mxu1 %v916_v12 }
 0x12d   :  { %v919_v17 = vpack.c.bf16 %v486_v14, %v485_v16  ;;  %v852_v18 = vpop.f32.mrb[38].mxu0  ;;  %918 = vmatprep.subr.bf16.mxu1 %v954_v7 }
 0x12e   :  { %v488_v19 = vmax.f32 %v852_v18, 0.0  ;;  %v440_v20 = vpop.f32.mrb[39].mxu0 }
 0x12f   :  { %v487_v21 = vmax.f32 %v440_v20, 0.0 }
 0x130   :  { %920 = vmatpush3.bf16.msra.mxu1 %v919_v17 }
 0x131   :  { %v922_v22 = vpack.c.bf16 %v488_v19, %v487_v21  ;;  %921 = vmatprep.subr.bf16.mxu1 %v954_v7 }
 0x134   :  { %923 = vmatpush3.bf16.msra.mxu1 %v922_v22 }
 0x137   :  { %870 = vmatmul.mubr.msk.f32.vlgmr.msra.gmra.mrb[2].mxu1 %vm494_vm2, %v491_v23 }
 0x1fa   :  { %v771_v24 = vpop.f32.mrb[0].mxu1 }
 0x1fb   :  { %v772_v25 = vpop.f32.mrb[1].mxu1 }
 0x1fc   :  { %v773_v26 = vadd.f32 %v772_v25, %v771_v24 }
 0x1fe   :  { %v565_v28 = vadd.f32 %v773_v26, %v493_v27 }
 0x20a   :  { %v634_v29 = vpop.f32.mrb[2].mxu1 }
 0x20b   :  { %v635_v30 = vadd.f32 %v634_v29, %v565_v28  ;;  %v871_v31 = vpop.f32.mrb[3].mxu1 }
 0x20d   :  { %638 = vst [vmem:[#allocation3] sm:$0xff] %v635_v30 }
 0x20e   :  { %940 = shalt.err (!%p937_p4)
}
 0x20f   :  { %s941_s26 = scalar_lea.hbm %s1174_s4, 128 }
 0x210   :  { %p942_p5 = scmp.ne.s32.totalorder %s1174_s4, %s941_s26  ;;  %p945_p6 = scmp.lt.u32.totalorder %s941_s26, %s1174_s4 }
 0x212   :  { %p947_p7 = pnand %p945_p6, %p942_p5 }
 0x214   :  { %950 = shalt.err (!%p947_p7)
}
 0x215   :  { %648 = dma.vmem_to_hbm [thread:$0]  %s646_s23, 128, %s1174_s4, [#allocation4]  }
 0x216   :  { %951 = dma.done.wait [#allocation4], 128  }
 0x217   :  { %952 = vsyncadd [#allocation4], 4294967168 }
 0x218   :  { %652 = vsyncpa [#allocation4], 1 }

</bundles_post_ra>
